<compile_context>
chip_gen: v7x
topology: tpu7x:2x2x1
jax: 0.10.0
libtpu: 0.0.40
codegen_flags: <defaults>
</compile_context>

<pallas_src>
import jax
import jax.numpy as jnp
from jax.experimental import pallas as pl
from jax.experimental.pallas import tpu as pltpu


def _round_up(x, m):
    return (x + m - 1) // m * m


def _ffn_kernel(x_ref, w1a_ref, b1a_ref, w1b_ref, b1b_ref, w2_ref, b2_ref,
                o_ref, acc_ref):
    # x_ref:   (tm, dim)
    # w1a_ref: (dim, th)   gate half of W1^T (hidden chunk)
    # b1a_ref: (1, th)
    # w1b_ref: (dim, th)   value half of W1^T (hidden chunk)
    # b1b_ref: (1, th)
    # w2_ref:  (th, dim)   W2^T (hidden chunk)
    # b2_ref:  (1, dim)
    # o_ref:   (tm, dim)
    # acc_ref: (tm, dim) f32 accumulator, resident across the hidden axis
    k = pl.program_id(1)

    @pl.when(k == 0)
    def _():
        acc_ref[...] = jnp.zeros_like(acc_ref)

    x = x_ref[...]
    # Two dots against the W1 halves: avoids materializing a (tm, 2*hidden)
    # f32 intermediate and keeps the chunk() split off the lane layout.
    h1 = jnp.dot(x, w1a_ref[...], preferred_element_type=jnp.float32) + b1a_ref[...]
    h2 = jnp.dot(x, w1b_ref[...], preferred_element_type=jnp.float32) + b1b_ref[...]

    gated = (h1 * jax.nn.sigmoid(h1)) * h2          # SiLU(x1) * x2, in f32

    acc_ref[...] += jnp.dot(gated.astype(w2_ref.dtype), w2_ref[...],
                            preferred_element_type=jnp.float32)

    @pl.when(k == pl.num_programs(1) - 1)
    def _():
        o_ref[...] = (acc_ref[...] + b2_ref[...]).astype(o_ref.dtype)
        # TODO(synk): training-mode dropout would be applied here.


def prepare_ffn_params(w1, b1, w2, b2):
    """One-time parameter prep (hoisted out of the per-call path).

    PyTorch nn.Linear layout in:
      w1: (2*hidden, dim), b1: (2*hidden,), w2: (dim, hidden), b2: (dim,)
    Returns transposed / split params ready for the kernel.
    """
    two_hidden = w1.shape[0]
    hidden = two_hidden // 2
    w1_t = jnp.transpose(w1)                  # (dim, 2*hidden)
    w1a = w1_t[:, :hidden]                    # gate half   (dim, hidden)
    w1b = w1_t[:, hidden:]                    # value half  (dim, hidden)
    b1a = b1[:hidden].reshape(1, hidden)
    b1b = b1[hidden:].reshape(1, hidden)
    w2_t = jnp.transpose(w2)                  # (hidden, dim)
    b2_2d = b2.reshape(1, -1)
    return w1a, b1a, w1b, b1b, w2_t, b2_2d


def _vmem_limit_bytes(tm, th, dim, x_bytes, w_bytes):
    dbl = 2                                    # default double-buffering
    total = 0
    total += tm * dim * x_bytes * dbl          # x tiles
    total += tm * dim * x_bytes * dbl          # out tiles
    total += 2 * dim * th * w_bytes * dbl      # w1a + w1b chunks
    total += 2 * 8 * th * 4 * dbl              # b1a + b1b (sublane-padded)
    total += th * dim * w_bytes * dbl          # w2 chunks
    total += 8 * dim * 4 * dbl                 # b2
    total += tm * dim * 4                      # f32 accumulator scratch
    total += 8 << 20                           # compiler / misc headroom
    # Clamp into [16 MiB default, 64 MiB = v7x physical VMEM].
    return int(min(max(total, 16 << 20), 64 << 20))


def feed_forward(x, params, *, tm=256, th=512):
    """x: (..., dim); params from prepare_ffn_params().

    tm: token tile (use 128 on v5e, 256 on v6e/v7x).
    th: hidden-dim tile, must be a multiple of 128 (falls back to the full
        hidden dim when hidden is not divisible by th, e.g. toy shapes).
    """
    w1a, b1a, w1b, b1b, w2_t, b2_2d = params
    orig_shape = x.shape
    dim = orig_shape[-1]
    hidden = w1a.shape[1]

    x2d = x.reshape(-1, dim)
    M = x2d.shape[0]

    # Token tile: at most tm, at least an 8-row multiple; pad M to a multiple.
    tm_eff = min(tm, _round_up(M, 8))
    M_pad = _round_up(M, tm_eff)
    if M_pad != M:
        x2d = jnp.pad(x2d, ((0, M_pad - M), (0, 0)))

    # Hidden tile: stream weights chunk-by-chunk when hidden divides evenly.
    th_eff = th if (hidden % th == 0) else hidden

    grid = (M_pad // tm_eff, hidden // th_eff)

    x_bytes = jnp.dtype(x.dtype).itemsize
    w_bytes = jnp.dtype(w1a.dtype).itemsize

    flops = 6 * M_pad * dim * hidden            # 2 halves of W1 + W2
    bytes_accessed = (
        2 * M_pad * dim * x_bytes               # x + out
        + 2 * dim * hidden * w_bytes            # w1a + w1b
        + hidden * dim * w_bytes                # w2
        + (2 * hidden + dim) * w_bytes          # biases
    )
    cost = pl.CostEstimate(flops=flops,
                           transcendentals=M_pad * hidden,
                           bytes_accessed=bytes_accessed)

    out2d = pl.pallas_call(
        _ffn_kernel,
        out_shape=jax.ShapeDtypeStruct((M_pad, dim), x.dtype),
        grid_spec=pltpu.PrefetchScalarGridSpec(
            num_scalar_prefetch=0,
            grid=grid,
            in_specs=[
                pl.BlockSpec((tm_eff, dim), lambda i, k: (i, 0)),    # x tile
                pl.BlockSpec((dim, th_eff), lambda i, k: (0, k)),    # W1 gate
                pl.BlockSpec((1, th_eff), lambda i, k: (0, k)),      # b1 gate
                pl.BlockSpec((dim, th_eff), lambda i, k: (0, k)),    # W1 value
                pl.BlockSpec((1, th_eff), lambda i, k: (0, k)),      # b1 value
                pl.BlockSpec((th_eff, dim), lambda i, k: (k, 0)),    # W2 chunk
                pl.BlockSpec((1, dim), lambda i, k: (0, 0)),         # b2
            ],
            out_specs=pl.BlockSpec((tm_eff, dim), lambda i, k: (i, 0)),
            scratch_shapes=[pltpu.VMEM((tm_eff, dim), jnp.float32)],
        ),
        compiler_params=pltpu.CompilerParams(
            dimension_semantics=("parallel", "arbitrary"),
            vmem_limit_bytes=_vmem_limit_bytes(tm_eff, th_eff, dim,
                                               x_bytes, w_bytes),
        ),
        cost_estimate=cost,
    )(x2d, w1a, b1a, w1b, b1b, w2_t, b2_2d)

    if M_pad != M:
        out2d = out2d[:M]
    return out2d.reshape(orig_shape)


def _reference(x, w1, b1, w2, b2):
    h = jnp.einsum("...d,hd->...h", x, w1) + b1
    x1, x2 = jnp.split(h, 2, axis=-1)
    g = (x1 * jax.nn.sigmoid(x1)) * x2
    return jnp.einsum("...h,dh->...d", g, w2) + b2


if __name__ == "__main__":
    # Shapes consistent with FeedForward(dim, hidden_dim, dropout) in eval mode.
    batch, seq = 2, 8
    dim, hidden_dim = 128, 256

    key = jax.random.PRNGKey(0)
    kx, k1, k2, k3, k4 = jax.random.split(key, 5)

    x = jax.random.normal(kx, (batch, seq, dim), dtype=jnp.float32)

    # nn.Linear(dim, hidden_dim*2): weight (2*hidden, dim), bias (2*hidden,)
    w1 = jax.random.normal(k1, (hidden_dim * 2, dim), dtype=jnp.float32) * 0.05
    b1 = jax.random.normal(k2, (hidden_dim * 2,), dtype=jnp.float32) * 0.05
    # nn.Linear(hidden_dim, dim): weight (dim, hidden), bias (dim,)
    w2 = jax.random.normal(k3, (dim, hidden_dim), dtype=jnp.float32) * 0.05
    b2 = jax.random.normal(k4, (dim,), dtype=jnp.float32) * 0.05

    # Weight transpose/split hoisted out of the per-call path (done once).
    params = prepare_ffn_params(w1, b1, w2, b2)

    out = feed_forward(x, params)
    out = jax.block_until_ready(out)

    ref = _reference(x, w1, b1, w2, b2)
    assert out.shape == (batch, seq, dim)
    assert jnp.allclose(out, ref, atol=1e-4, rtol=1e-4), "mismatch vs reference"

    print("KERNEL_OK")
</pallas_src>

<mosaic_0001>
module attributes {stable_mosaic.version = 11 : i64} {
  func.func @_ffn_kernel(%arg0: i32, %arg1: i32, %arg2: memref<16x128xf32, #tpu.memory_space<vmem>>, %arg3: memref<128x256xf32, #tpu.memory_space<vmem>>, %arg4: memref<1x256xf32, #tpu.memory_space<vmem>>, %arg5: memref<128x256xf32, #tpu.memory_space<vmem>>, %arg6: memref<1x256xf32, #tpu.memory_space<vmem>>, %arg7: memref<256x128xf32, #tpu.memory_space<vmem>>, %arg8: memref<1x128xf32, #tpu.memory_space<vmem>>, %arg9: memref<16x128xf32, #tpu.memory_space<vmem>>, %arg10: memref<16x128xf32, #tpu.memory_space<vmem>>) attributes {dimension_semantics = [#tpu.dimension_semantics<parallel>, #tpu.dimension_semantics<arbitrary>], iteration_bounds = array<i64: 1, 1>, scalar_prefetch = 0 : i64, scratch_operands = 1 : i64, tpu.core_type = #tpu.core_type<tc>, window_params = [{transform_indices = @transform_0, window_bounds = array<i64: 16, 128>}, {transform_indices = @transform_1, window_bounds = array<i64: 128, 256>}, {transform_indices = @transform_2, window_bounds = array<i64: 1, 256>}, {transform_indices = @transform_3, window_bounds = array<i64: 128, 256>}, {transform_indices = @transform_4, window_bounds = array<i64: 1, 256>}, {transform_indices = @transform_5, window_bounds = array<i64: 256, 128>}, {pipeline_mode = #tpu.pipeline_mode<synchronous>, transform_indices = @transform_6, window_bounds = array<i64: 1, 128>}, {transform_indices = @transform_7, window_bounds = array<i64: 16, 128>}]} {
    %c0_i32 = arith.constant 0 : i32
    %0 = arith.cmpi eq, %arg1, %c0_i32 : i32
    %1 = arith.extui %0 : i1 to i32
    %c0_i32_0 = arith.constant 0 : i32
    %2 = arith.cmpi ne, %1, %c0_i32_0 : i32
    scf.if %2 {
      %cst_21 = arith.constant 0.000000e+00 : f32
      %29 = vector.broadcast %cst_21 : f32 to vector<16x128xf32>
      %c0_22 = arith.constant 0 : index
      %c0_23 = arith.constant 0 : index
      %30 = vector.load %arg10[%c0_22, %c0_23] : memref<16x128xf32, #tpu.memory_space<vmem>>, vector<16x128xf32>
      tpu.vector_store %arg10[%c0_22, %c0_23], %29 {strides = array<i32>} : memref<16x128xf32, #tpu.memory_space<vmem>>, vector<16x128xf32>,
    } else {
    }
    %c0 = arith.constant 0 : index
    %c0_1 = arith.constant 0 : index
    %3 = vector.load %arg2[%c0, %c0_1] : memref<16x128xf32, #tpu.memory_space<vmem>>, vector<16x128xf32>
    %c0_2 = arith.constant 0 : index
    %c0_3 = arith.constant 0 : index
    %4 = vector.load %arg3[%c0_2, %c0_3] : memref<128x256xf32, #tpu.memory_space<vmem>>, vector<128x256xf32>
    %cst = arith.constant dense<0.000000e+00> : vector<16x256xf32>
    %5 = tpu.matmul %3, %4, %cst {dimension_numbers = #tpu.dot_dimension_numbers<[1], [0], [0], [1], [0, 0, 1, 1], [], []>} : vector<16x128xf32>, vector<128x256xf32>, vector<16x256xf32> -> vector<16x256xf32>
    %c0_4 = arith.constant 0 : index
    %c0_5 = arith.constant 0 : index
    %6 = vector.load %arg4[%c0_4, %c0_5] : memref<1x256xf32, #tpu.memory_space<vmem>>, vector<1x256xf32>
    %7 = vector.broadcast %6 : vector<1x256xf32> to vector<16x256xf32>
    %8 = arith.addf %5, %7 : vector<16x256xf32>
    %c0_6 = arith.constant 0 : index
    %c0_7 = arith.constant 0 : index
    %9 = vector.load %arg5[%c0_6, %c0_7] : memref<128x256xf32, #tpu.memory_space<vmem>>, vector<128x256xf32>
    %cst_8 = arith.constant dense<0.000000e+00> : vector<16x256xf32>
    %10 = tpu.matmul %3, %9, %cst_8 {dimension_numbers = #tpu.dot_dimension_numbers<[1], [0], [0], [1], [0, 0, 1, 1], [], []>} : vector<16x128xf32>, vector<128x256xf32>, vector<16x256xf32> -> vector<16x256xf32>
    %c0_9 = arith.constant 0 : index
    %c0_10 = arith.constant 0 : index
    %11 = vector.load %arg6[%c0_9, %c0_10] : memref<1x256xf32, #tpu.memory_space<vmem>>, vector<1x256xf32>
    %12 = vector.broadcast %11 : vector<1x256xf32> to vector<16x256xf32>
    %13 = arith.addf %10, %12 : vector<16x256xf32>
    %14 = arith.negf %8 : vector<16x256xf32>
    %15 = math.exp %14 : vector<16x256xf32>
    %cst_11 = arith.constant 1.000000e+00 : f32
    %16 = vector.broadcast %cst_11 : f32 to vector<16x256xf32>
    %17 = arith.addf %16, %15 : vector<16x256xf32>
    %18 = arith.divf %16, %17 : vector<16x256xf32>
    %19 = arith.mulf %8, %18 : vector<16x256xf32>
    %20 = arith.mulf %19, %13 : vector<16x256xf32>
    %c0_12 = arith.constant 0 : index
    %c0_13 = arith.constant 0 : index
    %21 = vector.load %arg10[%c0_12, %c0_13] : memref<16x128xf32, #tpu.memory_space<vmem>>, vector<16x128xf32>
    %c0_14 = arith.constant 0 : index
    %c0_15 = arith.constant 0 : index
    %22 = vector.load %arg7[%c0_14, %c0_15] : memref<256x128xf32, #tpu.memory_space<vmem>>, vector<256x128xf32>
    %cst_16 = arith.constant dense<0.000000e+00> : vector<16x128xf32>
    %23 = tpu.matmul %20, %22, %cst_16 {dimension_numbers = #tpu.dot_dimension_numbers<[1], [0], [0], [1], [0, 0, 1, 1], [], []>} : vector<16x256xf32>, vector<256x128xf32>, vector<16x128xf32> -> vector<16x128xf32>
    %24 = arith.addf %21, %23 : vector<16x128xf32>
    %c0_17 = arith.constant 0 : index
    %c0_18 = arith.constant 0 : index
    %25 = vector.load %arg10[%c0_17, %c0_18] : memref<16x128xf32, #tpu.memory_space<vmem>>, vector<16x128xf32>
    tpu.vector_store %arg10[%c0_17, %c0_18], %24 {strides = array<i32>} : memref<16x128xf32, #tpu.memory_space<vmem>>, vector<16x128xf32>,
    %c0_i32_19 = arith.constant 0 : i32
    %26 = arith.cmpi eq, %arg1, %c0_i32_19 : i32
    %27 = arith.extui %26 : i1 to i32
    %c0_i32_20 = arith.constant 0 : i32
    %28 = arith.cmpi ne, %27, %c0_i32_20 : i32
    scf.if %28 {
      %c0_21 = arith.constant 0 : index
      %c0_22 = arith.constant 0 : index
      %29 = vector.load %arg10[%c0_21, %c0_22] : memref<16x128xf32, #tpu.memory_space<vmem>>, vector<16x128xf32>
      %c0_23 = arith.constant 0 : index
      %c0_24 = arith.constant 0 : index
      %30 = vector.load %arg8[%c0_23, %c0_24] : memref<1x128xf32, #tpu.memory_space<vmem>>, vector<1x128xf32>
      %31 = vector.broadcast %30 : vector<1x128xf32> to vector<16x128xf32>
      %32 = arith.addf %29, %31 : vector<16x128xf32>
      %c0_25 = arith.constant 0 : index
      %c0_26 = arith.constant 0 : index
      %33 = vector.load %arg9[%c0_25, %c0_26] : memref<16x128xf32, #tpu.memory_space<vmem>>, vector<16x128xf32>
      tpu.vector_store %arg9[%c0_25, %c0_26], %32 {strides = array<i32>} : memref<16x128xf32, #tpu.memory_space<vmem>>, vector<16x128xf32>,
    } else {
    }
    return
  }
  func.func @transform_0(%arg0: i32, %arg1: i32) -> (i32, i32) {
    %c0_i32 = arith.constant 0 : i32
    %c0_i32_0 = arith.constant 0 : i32
    return %arg0, %c0_i32 : i32, i32
  }
  func.func @transform_1(%arg0: i32, %arg1: i32) -> (i32, i32) {
    %c0_i32 = arith.constant 0 : i32
    %c0_i32_0 = arith.constant 0 : i32
    return %c0_i32, %arg1 : i32, i32
  }
  func.func @transform_2(%arg0: i32, %arg1: i32) -> (i32, i32) {
    %c0_i32 = arith.constant 0 : i32
    %c0_i32_0 = arith.constant 0 : i32
    return %c0_i32, %arg1 : i32, i32
  }
  func.func @transform_3(%arg0: i32, %arg1: i32) -> (i32, i32) {
    %c0_i32 = arith.constant 0 : i32
    %c0_i32_0 = arith.constant 0 : i32
    return %c0_i32, %arg1 : i32, i32
  }
  func.func @transform_4(%arg0: i32, %arg1: i32) -> (i32, i32) {
    %c0_i32 = arith.constant 0 : i32
    %c0_i32_0 = arith.constant 0 : i32
    return %c0_i32, %arg1 : i32, i32
  }
  func.func @transform_5(%arg0: i32, %arg1: i32) -> (i32, i32) {
    %c0_i32 = arith.constant 0 : i32
    %c0_i32_0 = arith.constant 0 : i32
    return %arg1, %c0_i32 : i32, i32
  }
  func.func @transform_6(%arg0: i32, %arg1: i32) -> (i32, i32) {
    %c0_i32 = arith.constant 0 : i32
    %c0_i32_0 = arith.constant 0 : i32
    %c0_i32_1 = arith.constant 0 : i32
    return %c0_i32, %c0_i32_0 : i32, i32
  }
  func.func @transform_7(%arg0: i32, %arg1: i32) -> (i32, i32) {
    %c0_i32 = arith.constant 0 : i32
    %c0_i32_0 = arith.constant 0 : i32
    return %arg0, %c0_i32 : i32, i32
  }
}

</mosaic_0001>

<bundles_post_ra>
// kernel: tpu_custom_call.1
= control target key start
LH: loop header
LB: loop body
LE: loop exit
PB: predicated region body
PF: predicated region fallthrough
CT: control target
= control target key end

     0   :  { %12 = vsyncpa [#allocation4], 0  ;;  %s956_s0 = inlined_call_operand.hbm [shape: f32[16,128], index: 0, kind: input, shape index: {}]   ;;  %s957_s1 = inlined_call_operand.hbm [shape: f32[128,256], index: 1, kind: input, shape index: {}]   ;;  %s958_s2 = inlined_call_operand.vmem [shape: f32[1,256], index: 2, kind: input, shape index: {}]   ;;  %s959_s3 = inlined_call_operand.hbm [shape: f32[128,256], index: 3, kind: input, shape index: {}]   ;;  %s960_s4 = inlined_call_operand.vmem [shape: f32[1,256], index: 4, kind: input, shape index: {}]   ;;  %s961_s5 = inlined_call_operand.hbm [shape: f32[256,128], index: 5, kind: input, shape index: {}]   ;;  %s962_s6 = inlined_call_operand.vmem [shape: f32[1,128], index: 6, kind: input, shape index: {}]   ;;  %s963_s7 = inlined_call_operand.hbm [shape: f32[16,128], index: 7, kind: output, shape index: {}]  }
   0x1   :  { %13 = vsyncpa [#allocation7], 0 }
   0x2   :  { %14 = vsyncpa [#allocation10], 0 }
   0x3   :  { %15 = vsyncpa [#allocation5], 0  ;;  %s811_s24 = smov [#allocation6]   ;;  %s693_s28 = scalar_lea.hbm %s957_s1, 4096 }
   0x4   :  { %s33_s25 = sshll.u32 %s811_s24, 4  ;;  %p694_p0 = scmp.ne.s32.totalorder %s957_s1, %s693_s28  ;;  %s34_s25 = int_to_ptr.vmem [resolvable:$true] %s33_s25 }
   0x5   :  { %p697_p1 = scmp.lt.u32.totalorder %s693_s28, %s957_s1 }
   0x7   :  { %p699_p2 = pnand %p697_p1, %p694_p0 }
   0x9   :  { %702 = shalt.err (!%p699_p2)
}
   0xa   :  { %s703_s10 = scalar_lea.vmem %s34_s25, 4096  ;;  %p708_p4 = scmp.lt.s32.totalorder %s34_s25, %s34_s25 }
   0xb   :  { %p704_p3 = scmp.ne.s32.totalorder %s34_s25, %s703_s10  ;;  %p709_p5 = scmp.lt.s32.totalorder %s703_s10, %s703_s10 }
   0xd   :  { %p710_p6 = por %p709_p5, %p708_p4 }
   0xf   :  { %p711_p7 = pnand %p710_p6, %p704_p3 }
  0x11   :  { %714 = shalt.err (!%p711_p7)
}
  0x12   :  { %s812_s11 = smov 256   ;;  %s813_s12 = smov 16  }
  0x13   :  { %39 = dma.hbm_to_vmem [thread:$0]  %s957_s1, 4096, %s34_s25, [#allocation7], %s812_s11, %s812_s11, %s813_s12  }
  0x14   :  { %s814_s15 = smov [#allocation3]   ;;  %s715_s19 = scalar_lea.hbm %s956_s0, 256 }
  0x15   :  { %s21_s16 = sshll.u32 %s814_s15, 4  ;;  %p716_p8 = scmp.ne.s32.totalorder %s956_s0, %s715_s19  ;;  %s22_s16 = int_to_ptr.vmem [resolvable:$true] %s21_s16 }
  0x16   :  { %p719_p9 = scmp.lt.u32.totalorder %s715_s19, %s956_s0 }
  0x18   :  { %p721_p10 = pnand %p719_p9, %p716_p8 }
  0x1a   :  { %724 = shalt.err (!%p721_p10)
}
  0x1b   :  { %s725_s24 = scalar_lea.vmem %s22_s16, 256  ;;  %p730_p12 = scmp.lt.s32.totalorder %s22_s16, %s22_s16 }
  0x1c   :  { %p726_p11 = scmp.ne.s32.totalorder %s22_s16, %s725_s24  ;;  %p731_p13 = scmp.lt.s32.totalorder %s725_s24, %s725_s24 }
  0x1e   :  { %p732_p0 = por %p731_p13, %p730_p12 }
  0x20   :  { %p733_p1 = pnand %p732_p0, %p726_p11 }
  0x22   :  { %736 = shalt.err (!%p733_p1)
}
  0x23   :  { %s815_s1 = smov 128   ;;  %s816_s25 = smov 8  }
  0x24   :  { %27 = dma.hbm_to_vmem [thread:$0]  %s956_s0, 256, %s22_s16, [#allocation4], %s815_s1, %s815_s1, %s816_s25  }
  0x25   :  { %s817_s28 = smov [#allocation8]   ;;  %s818_s30 = smov [#allocation9]  }
  0x26   :  { %s47_s29 = sshll.u32 %s817_s28, 4  ;;  %s61_s8 = sshll.u32 %s818_s30, 4  ;;  %s48_s29 = int_to_ptr.vmem [resolvable:$true] %s47_s29  ;;  %s891_s8 = int_to_ptr.vmem [resolvable:$true] %s61_s8 }
  0x27   :  { %s737_s13 = scalar_lea.hbm %s959_s3, 4096 }
  0x28   :  { %p738_p2 = scmp.ne.s32.totalorder %s959_s3, %s737_s13  ;;  %p741_p3 = scmp.lt.u32.totalorder %s737_s13, %s959_s3 }
  0x2a   :  { %p743_p4 = pnand %p741_p3, %p738_p2 }
  0x2c   :  { %746 = shalt.err (!%p743_p4)
}
  0x2d   :  { %s747_s0 = scalar_lea.vmem %s48_s29, 4096  ;;  %p752_p6 = scmp.lt.s32.totalorder %s48_s29, %s48_s29 }
  0x2e   :  { %p748_p5 = scmp.ne.s32.totalorder %s48_s29, %s747_s0  ;;  %p753_p7 = scmp.lt.s32.totalorder %s747_s0, %s747_s0 }
  0x30   :  { %p754_p8 = por %p753_p7, %p752_p6 }
  0x32   :  { %p755_p9 = pnand %p754_p8, %p748_p5 }
  0x34   :  { %758 = shalt.err (!%p755_p9)
}
  0x35   :  { %53 = dma.hbm_to_vmem [thread:$0]  %s959_s3, 4096, %s48_s29, [#allocation7], %s812_s11, %s812_s11, %s813_s12  }
  0x36   :  { %s759_s22 = scalar_lea.hbm %s961_s5, 4096 }
  0x37   :  { %p760_p10 = scmp.ne.s32.totalorder %s961_s5, %s759_s22  ;;  %p763_p11 = scmp.lt.u32.totalorder %s759_s22, %s961_s5 }
  0x39   :  { %p765_p12 = pnand %p763_p11, %p760_p10 }
  0x3b   :  { %768 = shalt.err (!%p765_p12)
}
  0x3c   :  { %s769_s28 = scalar_lea.vmem %s891_s8, 4096  ;;  %p774_p0 = scmp.lt.s32.totalorder %s891_s8, %s891_s8 }
  0x3d   :  { %p770_p13 = scmp.ne.s32.totalorder %s891_s8, %s769_s28  ;;  %p775_p1 = scmp.lt.s32.totalorder %s769_s28, %s769_s28 }
  0x3f   :  { %p776_p2 = por %p775_p1, %p774_p0 }
  0x41   :  { %p777_p3 = pnand %p776_p2, %p770_p13 }
  0x43   :  { %780 = shalt.err (!%p777_p3)
}
  0x44   :  { %67 = dma.hbm_to_vmem [thread:$0]  %s961_s5, 4096, %s891_s8, [#allocation10], %s815_s1, %s815_s1, %s816_s25  }
  0x45   :  { %803 = dma.done.wait [#allocation4], 256  }
  0x46   :  { %804 = vsyncadd [#allocation4], 4294967040 }
  0x47   :  { %805 = dma.done.wait [#allocation7], 8192  }
  0x48   :  { %806 = vsyncadd [#allocation7], 4294959104 }
  0x49   :  { %807 = dma.done.wait [#allocation10], 4096  }
  0x4a   :  { %808 = vsyncadd [#allocation10], 4294963200  ;;  %v819_v0 = vmov 0.0   ;;  %v91_v1 = vld [vmem:[#allocation6 + $0x8] sm:$0xff]  ;;  %v93_v2 = vld [vmem:[#allocation6 + $0x18] sm:$0xff]  ;;  %s820_s8 = smov [#allocation11]  }
  0x4b   :  { %198 = vmatprep.mubr.f32.mxu0 %v819_v0  ;;  %319 = vmatprep.mubr.f32.mxu1 %v819_v0  ;;  %v90_v3 = vld [vmem:[#allocation6] sm:$0xff]  ;;  %v555_v4 = vpack.c.bf16 %v93_v2, %v91_v1  ;;  %v92_v5 = vld [vmem:[#allocation6 + $0x10] sm:$0xff]  ;;  %v95_v6 = vld [vmem:[#allocation6 + $0x28] sm:$0xff]  ;;  %s498_s9 = sshll.u32 %s820_s8, 4  ;;  %s499_s9 = int_to_ptr.vmem [resolvable:$true] %s498_s9 }
  0x4c   :  { %v97_v7 = vld [vmem:[#allocation6 + $0x38] sm:$0xff]  ;;  %v557_v8 = vpack.c.bf16 %v92_v5, %v90_v3  ;;  %v94_v10 = vld [vmem:[#allocation6 + $0x20] sm:$0xff]  ;;  %v96_v11 = vld [vmem:[#allocation6 + $0x30] sm:$0xff]  ;;  %s781_s10 = scalar_lea.vmem %s499_s9, 256  ;;  %p786_p5 = scmp.lt.s32.totalorder %s499_s9, %s499_s9 }
  0x4d   :  { %v559_v9 = vpack.c.bf16 %v97_v7, %v95_v6  ;;  %v99_v12 = vld [vmem:[#allocation6 + $0x48] sm:$0xff]  ;;  %556 = vmatprep.subr.bf16.mxu0 %v555_v4  ;;  %v101_v13 = vld [vmem:[#allocation6 + $0x58] sm:$0xff]  ;;  %v561_v14 = vpack.c.bf16 %v96_v11, %v94_v10  ;;  %v98_v16 = vld [vmem:[#allocation6 + $0x40] sm:$0xff]  ;;  %p782_p4 = scmp.ne.s32.totalorder %s499_s9, %s781_s10  ;;  %p787_p6 = scmp.lt.s32.totalorder %s781_s10, %s781_s10 }
  0x4e   :  { %558 = vmatpush1.bf16.msra.mxu0 %v557_v8  ;;  %v563_v15 = vpack.c.bf16 %v101_v13, %v99_v12  ;;  %v100_v17 = vld [vmem:[#allocation6 + $0x50] sm:$0xff]  ;;  %v103_v18 = vld [vmem:[#allocation6 + $0x68] sm:$0xff]  ;;  %v105_v19 = vld [vmem:[#allocation6 + $0x78] sm:$0xff] }
  0x4f   :  { %560 = vmatprep.subr.bf16.mxu0 %v559_v9  ;;  %v565_v20 = vpack.c.bf16 %v100_v17, %v98_v16  ;;  %v102_v21 = vld [vmem:[#allocation6 + $0x60] sm:$0xff]  ;;  %v567_v22 = vpack.c.bf16 %v105_v19, %v103_v18  ;;  %v104_v23 = vld [vmem:[#allocation6 + $0x70] sm:$0xff]  ;;  %v212_v24 = vld [vmem:[#allocation8 + $0x8] sm:$0xff]  ;;  %p788_p7 = por %p787_p6, %p786_p5 }
  0x50   :  { %v214_v25 = vld [vmem:[#allocation8 + $0x18] sm:$0xff]  ;;  %v107_v26 = vld [vmem:[#allocation6 + $0x88] sm:$0xff]  ;;  %v211_v29 = vld [vmem:[#allocation8] sm:$0xff]  ;;  %v569_v32 = vpack.c.bf16 %v104_v23, %v102_v21 }
  0x51   :  { %v109_v27 = vld [vmem:[#allocation6 + $0x98] sm:$0xff]  ;;  %v587_v28 = vpack.c.bf16 %v214_v25, %v212_v24  ;;  %v106_v30 = vld [vmem:[#allocation6 + $0x80] sm:$0xff]  ;;  %v213_v31 = vld [vmem:[#allocation8 + $0x10] sm:$0xff]  ;;  %p789_p8 = pnand %p788_p7, %p782_p4 }
  0x52   :  { %562 = vmatpush1.bf16.msra.mxu0 %v561_v14  ;;  %v108_v33 = vld [vmem:[#allocation6 + $0x90] sm:$0xff]  ;;  %v589_v34 = vpack.c.bf16 %v213_v31, %v211_v29  ;;  %v216_v35 = vld [vmem:[#allocation8 + $0x28] sm:$0xff]  ;;  %v218_v36 = vld [vmem:[#allocation8 + $0x38] sm:$0xff]  ;;  %v571_v37 = vpack.c.bf16 %v109_v27, %v107_v26 }
  0x53   :  { %564 = vmatprep.subr.bf16.mxu0 %v563_v15  ;;  %588 = vmatprep.subr.bf16.mxu1 %v587_v28  ;;  %v591_v38 = vpack.c.bf16 %v218_v36, %v216_v35  ;;  %v215_v39 = vld [vmem:[#allocation8 + $0x20] sm:$0xff]  ;;  %v217_v40 = vld [vmem:[#allocation8 + $0x30] sm:$0xff]  ;;  %v220_v41 = vld [vmem:[#allocation8 + $0x48] sm:$0xff]  ;;  %v573_v49 = vpack.c.bf16 %v108_v33, %v106_v30 }
  0x54   :  { %v111_v42 = vld [vmem:[#allocation6 + $0xa8] sm:$0xff]  ;;  %v113_v43 = vld [vmem:[#allocation6 + $0xb8] sm:$0xff]  ;;  %590 = vmatpush1.bf16.msra.mxu1 %v589_v34  ;;  %v593_v44 = vpack.c.bf16 %v217_v40, %v215_v39  ;;  %v219_v47 = vld [vmem:[#allocation8 + $0x40] sm:$0xff] }
  0x55   :  { %v222_v45 = vld [vmem:[#allocation8 + $0x58] sm:$0xff]  ;;  %592 = vmatprep.subr.bf16.mxu1 %v591_v38  ;;  %v221_v48 = vld [vmem:[#allocation8 + $0x50] sm:$0xff]  ;;  %v224_v50 = vld [vmem:[#allocation8 + $0x68] sm:$0xff]  ;;  %v575_v52 = vpack.c.bf16 %v113_v43, %v111_v42 }
  0x56   :  { %566 = vmatpush1.bf16.msra.mxu0 %v565_v20  ;;  %v595_v46 = vpack.c.bf16 %v222_v45, %v220_v41  ;;  %v226_v51 = vld [vmem:[#allocation8 + $0x78] sm:$0xff]  ;;  %v110_v53 = vld [vmem:[#allocation6 + $0xa0] sm:$0xff]  ;;  %v112_v54 = vld [vmem:[#allocation6 + $0xb0] sm:$0xff]  ;;  %v597_v57 = vpack.c.bf16 %v221_v48, %v219_v47 }
  0x57   :  { %568 = vmatprep.subr.bf16.mxu0 %v567_v22  ;;  %v115_v55 = vld [vmem:[#allocation6 + $0xc8] sm:$0xff]  ;;  %v117_v56 = vld [vmem:[#allocation6 + $0xd8] sm:$0xff]  ;;  %v599_v58 = vpack.c.bf16 %v226_v51, %v224_v50  ;;  %v223_v59 = vld [vmem:[#allocation8 + $0x60] sm:$0xff]  ;;  %v577_v61 = vpack.c.bf16 %v112_v54, %v110_v53 }
  0x58   :  { %594 = vmatpush1.bf16.msra.mxu1 %v593_v44  ;;  %v225_v60 = vld [vmem:[#allocation8 + $0x70] sm:$0xff]  ;;  %v228_v62 = vld [vmem:[#allocation8 + $0x88] sm:$0xff]  ;;  %v230_v63 = vld [vmem:[#allocation8 + $0x98] sm:$0xff]  ;;  %v579_v1 = vpack.c.bf16 %v117_v56, %v115_v55 }
  0x59   :  { %596 = vmatprep.subr.bf16.mxu1 %v595_v46  ;;  %v114_v2 = vld [vmem:[#allocation6 + $0xc0] sm:$0xff]  ;;  %v116_v3 = vld [vmem:[#allocation6 + $0xd0] sm:$0xff]  ;;  %v119_v4 = vld [vmem:[#allocation6 + $0xe8] sm:$0xff]  ;;  %v601_v6 = vpack.c.bf16 %v225_v60, %v223_v59  ;;  %v603_v7 = vpack.c.bf16 %v230_v63, %v228_v62 }
  0x5a   :  { %570 = vmatpush1.bf16.msra.mxu0 %v569_v32  ;;  %v121_v5 = vld [vmem:[#allocation6 + $0xf8] sm:$0xff]  ;;  %v227_v8 = vld [vmem:[#allocation8 + $0x80] sm:$0xff]  ;;  %v229_v9 = vld [vmem:[#allocation8 + $0x90] sm:$0xff]  ;;  %v581_v10 = vpack.c.bf16 %v116_v3, %v114_v2 }
  0x5b   :  { %572 = vmatprep.subr.bf16.mxu0 %v571_v37  ;;  %v232_v11 = vld [vmem:[#allocation8 + $0xa8] sm:$0xff]  ;;  %v234_v12 = vld [vmem:[#allocation8 + $0xb8] sm:$0xff]  ;;  %v583_v13 = vpack.c.bf16 %v121_v5, %v119_v4  ;;  %v118_v14 = vld [vmem:[#allocation6 + $0xe0] sm:$0xff]  ;;  %v605_v16 = vpack.c.bf16 %v229_v9, %v227_v8 }
  0x5c   :  { %598 = vmatpush1.bf16.msra.mxu1 %v597_v57  ;;  %v120_v15 = vld [vmem:[#allocation6 + $0xf0] sm:$0xff]  ;;  %v607_v17 = vpack.c.bf16 %v234_v12, %v232_v11  ;;  %v231_v18 = vld [vmem:[#allocation8 + $0xa0] sm:$0xff]  ;;  %v236_v21 = vld [vmem:[#allocation8 + $0xc8] sm:$0xff] }
  0x5d   :  { %600 = vmatprep.subr.bf16.mxu1 %v599_v58  ;;  %v233_v19 = vld [vmem:[#allocation8 + $0xb0] sm:$0xff]  ;;  %v585_v20 = vpack.c.bf16 %v120_v15, %v118_v14  ;;  %v238_v22 = vld [vmem:[#allocation8 + $0xd8] sm:$0xff]  ;;  %v235_v25 = vld [vmem:[#allocation8 + $0xc0] sm:$0xff] }
  0x5e   :  { %574 = vmatpush1.bf16.msra.mxu0 %v573_v49  ;;  %v609_v23 = vpack.c.bf16 %v233_v19, %v231_v18  ;;  %v611_v24 = vpack.c.bf16 %v238_v22, %v236_v21  ;;  %v237_v26 = vld [vmem:[#allocation8 + $0xd0] sm:$0xff]  ;;  %v240_v28 = vld [vmem:[#allocation8 + $0xe8] sm:$0xff]  ;;  %v242_v29 = vld [vmem:[#allocation8 + $0xf8] sm:$0xff] }
  0x5f   :  { %576 = vmatprep.subr.bf16.mxu0 %v575_v52  ;;  %v88_v27 = vld [vmem:[#allocation3] sm:$0xff]  ;;  %v613_v30 = vpack.c.bf16 %v237_v26, %v235_v25  ;;  %v615_v31 = vpack.c.bf16 %v242_v29, %v240_v28  ;;  %v239_v32 = vld [vmem:[#allocation8 + $0xe0] sm:$0xff]  ;;  %v89_v34 = vld [vmem:[#allocation3 + $0x8] sm:$0xff] }
  0x60   :  { %602 = vmatpush1.bf16.msra.mxu1 %v601_v6  ;;  %v241_v33 = vld [vmem:[#allocation8 + $0xf0] sm:$0xff]  ;;  %v382_v36 = vld [vmem:[#allocation9 + $0x80] sm:$0xff]  ;;  %v383_v37 = vld [vmem:[#allocation9 + $0x88] sm:$0xff] }
  0x61   :  { %604 = vmatprep.subr.bf16.mxu1 %v603_v7  ;;  %v617_v35 = vpack.c.bf16 %v241_v33, %v239_v32  ;;  %v619_v38 = vpack.c.bf16 %v383_v37, %v382_v36  ;;  %v366_v39 = vld [vmem:[#allocation9] sm:$0xff]  ;;  %v367_v40 = vld [vmem:[#allocation9 + $0x8] sm:$0xff]  ;;  %v384_v42 = vld [vmem:[#allocation9 + $0x90] sm:$0xff] }
  0x62   :  { %578 = vmatpush1.bf16.msra.mxu0 %v577_v61  ;;  %v621_v41 = vpack.c.bf16 %v367_v40, %v366_v39  ;;  %v385_v43 = vld [vmem:[#allocation9 + $0x98] sm:$0xff]  ;;  %v368_v45 = vld [vmem:[#allocation9 + $0x10] sm:$0xff]  ;;  %v387_v48 = vld [vmem:[#allocation9 + $0xa8] sm:$0xff] }
  0x63   :  { %580 = vmatprep.subr.bf16.mxu0 %v579_v1  ;;  %v623_v44 = vpack.c.bf16 %v385_v43, %v384_v42  ;;  %v369_v46 = vld [vmem:[#allocation9 + $0x18] sm:$0xff]  ;;  %v370_v50 = vld [vmem:[#allocation9 + $0x20] sm:$0xff]  ;;  %v371_v51 = vld [vmem:[#allocation9 + $0x28] sm:$0xff] }
  0x64   :  { %606 = vmatpush1.bf16.msra.mxu1 %v605_v16  ;;  %v625_v47 = vpack.c.bf16 %v369_v46, %v368_v45  ;;  %v629_v52 = vpack.c.bf16 %v371_v51, %v370_v50  ;;  %v388_v53 = vld [vmem:[#allocation9 + $0xb0] sm:$0xff]  ;;  %v389_v54 = vld [vmem:[#allocation9 + $0xb8] sm:$0xff]  ;;  %v390_v59 = vld [vmem:[#allocation9 + $0xc0] sm:$0xff] }
  0x65   :  { %608 = vmatprep.subr.bf16.mxu1 %v607_v17  ;;  %v631_v55 = vpack.c.bf16 %v389_v54, %v388_v53  ;;  %v372_v56 = vld [vmem:[#allocation9 + $0x30] sm:$0xff]  ;;  %v373_v57 = vld [vmem:[#allocation9 + $0x38] sm:$0xff]  ;;  %v391_v60 = vld [vmem:[#allocation9 + $0xc8] sm:$0xff] }
  0x66   :  { %582 = vmatpush1.bf16.msra.mxu0 %v581_v10  ;;  %v633_v58 = vpack.c.bf16 %v373_v57, %v372_v56  ;;  %v635_v61 = vpack.c.bf16 %v391_v60, %v390_v59  ;;  %v374_v62 = vld [vmem:[#allocation9 + $0x40] sm:$0xff]  ;;  %v375_v63 = vld [vmem:[#allocation9 + $0x48] sm:$0xff]  ;;  %v392_v2 = vld [vmem:[#allocation9 + $0xd0] sm:$0xff] }
  0x67   :  { %584 = vmatprep.subr.bf16.mxu0 %v583_v13  ;;  %v637_v1 = vpack.c.bf16 %v375_v63, %v374_v62  ;;  %v393_v3 = vld [vmem:[#allocation9 + $0xd8] sm:$0xff]  ;;  %v376_v5 = vld [vmem:[#allocation9 + $0x50] sm:$0xff]  ;;  %v394_v8 = vld [vmem:[#allocation9 + $0xe0] sm:$0xff] }
  0x68   :  { %610 = vmatpush1.bf16.msra.mxu1 %v609_v23  ;;  %v639_v4 = vpack.c.bf16 %v393_v3, %v392_v2  ;;  %v377_v6 = vld [vmem:[#allocation9 + $0x58] sm:$0xff]  ;;  %v395_v9 = vld [vmem:[#allocation9 + $0xe8] sm:$0xff]  ;;  %v378_v11 = vld [vmem:[#allocation9 + $0x60] sm:$0xff] }
  0x69   :  { %612 = vmatprep.subr.bf16.mxu1 %v611_v24  ;;  %v641_v7 = vpack.c.bf16 %v377_v6, %v376_v5  ;;  %v643_v10 = vpack.c.bf16 %v395_v9, %v394_v8  ;;  %v379_v12 = vld [vmem:[#allocation9 + $0x68] sm:$0xff]  ;;  %v396_v14 = vld [vmem:[#allocation9 + $0xf0] sm:$0xff]  ;;  %v397_v15 = vld [vmem:[#allocation9 + $0xf8] sm:$0xff] }
  0x6a   :  { %586 = vmatpush1.bf16.msra.mxu0 %v585_v20  ;;  %v645_v13 = vpack.c.bf16 %v379_v12, %v378_v11  ;;  %v647_v16 = vpack.c.bf16 %v397_v15, %v396_v14  ;;  %v380_v17 = vld [vmem:[#allocation9 + $0x70] sm:$0xff]  ;;  %v381_v18 = vld [vmem:[#allocation9 + $0x78] sm:$0xff]  ;;  %v124_v20 = vlaneseq }
  0x6b   :  { %620 = vmatprep.subr.bf16.mxu0 %v619_v38  ;;  %v649_v19 = vpack.c.bf16 %v381_v18, %v380_v17  ;;  %v122_v23 = vld [vmem:[%s958_s2] sm:$0x3] }
  0x6c   :  { %614 = vmatpush1.bf16.msra.mxu1 %v613_v30  ;;  %v125_v21 = vshrl.u32 %v124_v20, 7  ;;  %v516_v8 = vld [vmem:[%s962_s6] ss:$0 sm:$0xff] }
  0x6d   :  { %199 = vmatmul.mubr.f32.vlgmr.msra.gmra.mrb[0].mxu0 %v88_v27  ;;  %616 = vmatprep.subr.bf16.mxu1 %v615_v31 }
  0x6e   :  { %204 = vmatprep.mubr.f32.mxu0 %v819_v0  ;;  %622 = vmatpush3.bf16.msra.mxu0 %v621_v41  ;;  %v126_v22 = vsub.s32 0, %v125_v21  ;;  %v130_v24 = vsub.s32 1, %v125_v21 }
  0x6f   :  { %624 = vmatprep.subr.bf16.mxu0 %v623_v44 }
  0x70   :  { %618 = vmatpush1.bf16.msra.mxu1 %v617_v35  ;;  %v127_v25 = vrot.slane %v122_v23, %v126_v22  ;;  %v131_v26 = vrot.slane %v122_v23, %v130_v24 }
  0x71   :  { %205 = vmatmul.mubr.f32.gmra.mrb[2].mxu0 %v89_v34  ;;  %651 = vmatprep.subr.bf16.mxu1 %v619_v38 }
  0x72   :  { %626 = vmatpush3.bf16.msra.mxu0 %v625_v47 }
  0x73   :  { %320 = vmatmul.mubr.f32.vlgmr.msra.gmra.mrb[0].mxu1 %v88_v27 }
  0x74   :  { %325 = vmatprep.mubr.f32.mxu1 %v819_v0  ;;  %659 = vmatpush3.bf16.msra.mxu1 %v621_v41  ;;  %v386_v0 = vld [vmem:[#allocation9 + $0xa0] sm:$0xff] }
  0x75   :  { %652 = vmatprep.subr.bf16.mxu1 %v623_v44  ;;  %v627_v49 = vpack.c.bf16 %v387_v48, %v386_v0 }
  0x77   :  { %326 = vmatmul.mubr.f32.gmra.mrb[2].mxu1 %v89_v34  ;;  %628 = vmatprep.subr.bf16.mxu0 %v627_v49 }
  0x78   :  { %660 = vmatpush3.bf16.msra.mxu1 %v625_v47  ;;  %630 = vmatpush3.bf16.msra.mxu0 %v629_v52 }
  0x79   :  { %653 = vmatprep.subr.bf16.mxu1 %v627_v49  ;;  %632 = vmatprep.subr.bf16.mxu0 %v631_v55  ;;  %v243_v49 = vld [vmem:[%s960_s4] sm:$0x3] }
  0x7a   :  { %v248_v51 = vrot.slane %v243_v49, %v126_v22 }
  0x7c   :  { %661 = vmatpush3.bf16.msra.mxu1 %v629_v52  ;;  %634 = vmatpush3.bf16.msra.mxu0 %v633_v58  ;;  %v252_v52 = vrot.slane %v243_v49, %v130_v24 }
  0x7d   :  { %654 = vmatprep.subr.bf16.mxu1 %v631_v55  ;;  %636 = vmatprep.subr.bf16.mxu0 %v635_v61 }
  0x80   :  { %662 = vmatpush3.bf16.msra.mxu1 %v633_v58  ;;  %638 = vmatpush3.bf16.msra.mxu0 %v637_v1 }
  0x81   :  { %655 = vmatprep.subr.bf16.mxu1 %v635_v61  ;;  %640 = vmatprep.subr.bf16.mxu0 %v639_v4 }
  0x84   :  { %663 = vmatpush3.bf16.msra.mxu1 %v637_v1  ;;  %642 = vmatpush3.bf16.msra.mxu0 %v641_v7 }
  0x85   :  { %656 = vmatprep.subr.bf16.mxu1 %v639_v4  ;;  %644 = vmatprep.subr.bf16.mxu0 %v643_v10 }
  0x88   :  { %664 = vmatpush3.bf16.msra.mxu1 %v641_v7  ;;  %646 = vmatpush3.bf16.msra.mxu0 %v645_v13 }
  0x89   :  { %657 = vmatprep.subr.bf16.mxu1 %v643_v10  ;;  %648 = vmatprep.subr.bf16.mxu0 %v647_v16 }
  0x8c   :  { %665 = vmatpush3.bf16.msra.mxu1 %v645_v13  ;;  %650 = vmatpush3.bf16.msra.mxu0 %v649_v19 }
  0x8d   :  { %658 = vmatprep.subr.bf16.mxu1 %v647_v16 }
  0x90   :  { %666 = vmatpush3.bf16.msra.mxu1 %v649_v19 }
 0x140   :  { %v200_v27 = vpop.f32.mrb[0].mxu0 }
 0x141   :  { %v201_v28 = vadd.f32 %v200_v27, %v127_v25  ;;  %v202_v29 = vpop.f32.mrb[1].mxu0 }
 0x142   :  { %v203_v30 = vadd.f32 %v202_v29, %v131_v26 }
 0x143   :  { %v512_v31 = vmul.f32 -1.442695, %v201_v28 }
 0x144   :  { %v513_v32 = vmul.f32 -1.442695, %v203_v30  ;;  %v206_v33 = vpop.f32.mrb[2].mxu0 }
 0x145   :  { %677 = vpow2.f32 %v512_v31  ;;  %v207_v34 = vadd.f32 %v206_v33, %v127_v25  ;;  %v208_v35 = vpop.f32.mrb[3].mxu0 }
 0x146   :  { %679 = vpow2.f32 %v513_v32  ;;  %v209_v36 = vadd.f32 %v208_v35, %v131_v26  ;;  %v321_v39 = vpop.f32.mrb[0].mxu1 }
 0x147   :  { %v514_v37 = vmul.f32 -1.442695, %v207_v34  ;;  %v323_v40 = vpop.f32.mrb[1].mxu1  ;;  %v322_v53 = vadd.f32 %v321_v39, %v248_v51 }
 0x148   :  { %v515_v38 = vmul.f32 -1.442695, %v209_v36  ;;  %v324_v55 = vadd.f32 %v323_v40, %v252_v52 }
 0x149   :  { %681 = vpow2.f32 %v514_v37 }
 0x14a   :  { %683 = vpow2.f32 %v515_v38  ;;  %v327_v41 = vpop.f32.mrb[2].mxu1 }
 0x14b   :  { %v329_v43 = vpop.f32.mrb[3].mxu1  ;;  %v328_v60 = vadd.f32 %v327_v41, %v248_v51 }
 0x14c   :  { %v330_v63 = vadd.f32 %v329_v43, %v252_v52 }
 0x14f   :  { %v678_v42 = vpop.eup %677 }
 0x150   :  { %v680_v44 = vpop.eup %679  ;;  %v344_v45 = vadd.f32 1.0, %v678_v42 }
 0x151   :  { %v345_v46 = vadd.f32 1.0, %v680_v44 }
 0x152   :  { %685 = vrcp.f32 %v344_v45 }
 0x153   :  { %v682_v47 = vpop.eup %681  ;;  %687 = vrcp.f32 %v345_v46 }
 0x154   :  { %v684_v0 = vpop.eup %683  ;;  %v346_v48 = vadd.f32 1.0, %v682_v47 }
 0x155   :  { %v347_v50 = vadd.f32 1.0, %v684_v0 }
 0x156   :  { %689 = vrcp.f32 %v346_v48 }
 0x157   :  { %691 = vrcp.f32 %v347_v50 }
 0x15c   :  { %v686_v54 = vpop.eup %685 }
 0x15d   :  { %v688_v56 = vpop.eup %687  ;;  %v356_v57 = vmul.f32 %v686_v54, %v201_v28 }
 0x15e   :  { %v357_v58 = vmul.f32 %v688_v56, %v203_v30 }
 0x15f   :  { %v360_v59 = vmul.f32 %v356_v57, %v322_v53 }
 0x160   :  { %v690_v61 = vpop.eup %689  ;;  %v361_v62 = vmul.f32 %v357_v58, %v324_v55 }
 0x161   :  { %v692_v1 = vpop.eup %691  ;;  %v358_v2 = vmul.f32 %v690_v61, %v207_v34 }
 0x162   :  { %v359_v3 = vmul.f32 %v692_v1, %v209_v36  ;;  %462 = vmatprep.mubr.f32.mxu0 %v361_v62 }
 0x163   :  { %v362_v4 = vmul.f32 %v358_v2, %v328_v60  ;;  %463 = vmatmul.mubr.f32.vlgmr.msra.gmra.mrb[4].mxu0 %v360_v59 }
 0x164   :  { %v363_v5 = vmul.f32 %v359_v3, %v330_v63 }
 0x166   :  { %467 = vmatprep.mubr.f32.mxu1 %v363_v5 }
 0x167   :  { %468 = vmatmul.mubr.f32.vlgmr.msra.gmra.mrb[4].mxu1 %v362_v4 }
 0x236   :  { %v549_v6 = vpop.f32.mrb[4].mxu0 }
 0x237   :  { %v550_v7 = vpop.f32.mrb[5].mxu0 }
 0x238   :  { %v551_v9 = vadd.f32 %v550_v7, %v549_v6 }
 0x23a   :  { %v489_v10 = vadd.f32 %v551_v9, %v516_v8  ;;  %v552_v11 = vpop.f32.mrb[4].mxu1 }
 0x23b   :  { %v553_v12 = vpop.f32.mrb[5].mxu1 }
 0x23c   :  { %491 = vst [vmem:[#allocation11] sm:$0xff] %v489_v10  ;;  %v554_v13 = vadd.f32 %v553_v12, %v552_v11 }
 0x23e   :  { %v490_v14 = vadd.f32 %v554_v13, %v516_v8 }
 0x240   :  { %492 = vst [vmem:[#allocation11 + $0x8] sm:$0xff] %v490_v14 }
 0x241   :  { %792 = shalt.err (!%p789_p8)
}
 0x242   :  { %s793_s14 = scalar_lea.hbm %s963_s7, 256 }
 0x243   :  { %p794_p9 = scmp.ne.s32.totalorder %s963_s7, %s793_s14  ;;  %p797_p10 = scmp.lt.u32.totalorder %s793_s14, %s963_s7 }
 0x245   :  { %p799_p11 = pnand %p797_p10, %p794_p9 }
 0x247   :  { %802 = shalt.err (!%p799_p11)
}
 0x248   :  { %504 = dma.vmem_to_hbm [thread:$0]  %s499_s9, 256, %s963_s7, [#allocation5], %s815_s1, %s815_s1, %s816_s25  }
 0x249   :  { %809 = dma.done.wait [#allocation5], 256  }
 0x24a   :  { %810 = vsyncadd [#allocation5], 4294967040 }
 0x24b   :  { %508 = vsyncpa [#allocation4], 1 }
 0x24c   :  { %509 = vsyncpa [#allocation7], 1 }
 0x24d   :  { %510 = vsyncpa [#allocation10], 1 }
 0x24e   :  { %511 = vsyncpa [#allocation5], 1 }

</bundles_post_ra>
